<compile_context>
chip_gen: v5e
topology: v5e:2x2
jax: 0.10.0
libtpu: 0.0.40
codegen_flags: <defaults>
</compile_context>

<pallas_src>
import functools

import jax
import jax.numpy as jnp
from jax.experimental import pallas as pl
from jax.experimental.pallas import tpu as pltpu

HEAD_PAD = 128   # padded head width fed to the MXU (any N <= one MXU tile costs the same)
OUT_ROWS = 8     # rows of the transposed lane-dense (OUT_ROWS, B) output (3 real + 5 pad)
TILE_B = 4096    # batch rows per grid step; static arg -- sweep 4096..8192
VMEM_LIMIT_BYTES = 48 * 1024 * 1024  # explicit scoped-VMEM budget: covers tile_b up to
                                     # ~8192 on v5e (16 MiB default) with headroom on
                                     # v7x's 64 MiB physical VMEM.


def metacog_kernel(x_ref, w1_ref, b1_ref, w2_ref, b2_ref, out_ref):
    # x arrives as f32 straight from HBM; cast to bf16 on the VPU (hidden under
    # the MXU / DMA) instead of a separate wrapper-side XLA cast pass.
    x = x_ref[...].astype(jnp.bfloat16)

    # Hidden layer on the MXU: bf16 operands, f32 accumulation.
    h = jnp.dot(x, w1_ref[...], preferred_element_type=jnp.float32)
    h = jnp.maximum(h + b1_ref[...], 0.0)                 # bias + ReLU in f32

    # Head matmul, 3 real columns padded to 128 lanes (same vmatmul count).
    logits = jnp.dot(h.astype(jnp.bfloat16), w2_ref[...],
                     preferred_element_type=jnp.float32)

    # Keep only OUT_ROWS columns, add bias, then transpose to a lane-dense
    # (OUT_ROWS, tb) layout: the transpose rides the otherwise-idle XLU, the
    # sigmoid/softplus run on tb/128 dense vregs instead of tb/8 nearly-empty
    # ones, and the store lowers to dense (unmasked) vst.
    z = logits[:, :OUT_ROWS] + b2_ref[...]                # (tb, OUT_ROWS); b2 is (1, OUT_ROWS)
    zt = z.T                                              # (OUT_ROWS, tb)

    sig = jax.nn.sigmoid(zt)                              # rows 0, 1: confidence / mistake
    sp = jnp.logaddexp(zt, 0.0)                           # row 2: numerically stable softplus
    row = jax.lax.broadcasted_iota(jnp.int32, zt.shape, 0)
    out_ref[...] = jnp.where(row == 2, sp, sig)


def prepare_params(w1, b1, w2, b2):
    """One-time packing: pad the 3-wide head and pre-cast the matmul operands to
    bf16 so no per-call padding / cast work remains in the forward wrapper."""
    D_in, H = w1.shape
    w2_p = (jnp.zeros((H, HEAD_PAD), jnp.float32).at[:, :3].set(w2)
            .astype(jnp.bfloat16))
    b2_p = jnp.zeros((1, OUT_ROWS), jnp.float32).at[0, :3].set(b2)
    return (w1.astype(jnp.bfloat16),
            b1.reshape(1, H).astype(jnp.float32),
            w2_p,
            b2_p)


@functools.partial(jax.jit, static_argnames=("tile_b",))
def metacognitive_forward(state, params, tile_b=TILE_B):
    """state: (B, D_in) f32; params from prepare_params(). Returns dict of (B,) arrays."""
    w1, b1_2d, w2_p, b2_p = params
    B, D_in = state.shape
    H = w1.shape[1]

    if B <= tile_b:
        tb = B            # single tile: blocks equal full array dims (always legal)
    else:
        # Multi-tile path: the lane-dense output block needs tb % 128 == 0 (this
        # also satisfies the bf16 sublane multiple-of-16 packing).  B > tb here,
        # so grid >= 2 and the "parallel" axis can feed both v7x TensorCores.
        tb = max(128, (tile_b // 128) * 128)
    grid = (pl.cdiv(B, tb),)   # ragged last tile handled by Pallas masked writes;
                               # garbage tail rows only affect masked-out outputs
                               # (rows of the matmuls are independent).

    out = pl.pallas_call(
        metacog_kernel,
        out_shape=jax.ShapeDtypeStruct((OUT_ROWS, B), jnp.float32),
        grid=grid,
        in_specs=[
            pl.BlockSpec((tb, D_in), lambda i: (i, 0)),       # x: streamed f32 per tile
            pl.BlockSpec((D_in, H), lambda i: (0, 0)),        # weights: VMEM-resident
            pl.BlockSpec((1, H), lambda i: (0, 0)),
            pl.BlockSpec((H, HEAD_PAD), lambda i: (0, 0)),
            pl.BlockSpec((1, OUT_ROWS), lambda i: (0, 0)),
        ],
        out_specs=pl.BlockSpec((OUT_ROWS, tb), lambda i: (0, i)),   # lane-dense writeback
        compiler_params=pltpu.CompilerParams(
            dimension_semantics=("parallel",),   # shard batch tiles across TCs (v7x)
            vmem_limit_bytes=VMEM_LIMIT_BYTES,
        ),
    )(state, w1, b1_2d, w2_p, b2_p)

    return {
        "confidence": out[0, :],
        "mistake_detection": out[1, :],
        "time_needed": out[2, :],
    }
    # TODO(synk): optionally emit rows 0/1 as bf16 once downstream tolerance allows
    # (halves remaining output writeback); kept f32 here to preserve module semantics.


def init_params(key, input_dim, hidden_dim=128):
    """Deterministic synthetic init (PyTorch-style uniform bounds)."""
    k1, k2, k3, k4 = jax.random.split(key, 4)
    lim1 = 1.0 / (input_dim ** 0.5)
    lim2 = 1.0 / (hidden_dim ** 0.5)
    w1 = jax.random.uniform(k1, (input_dim, hidden_dim), jnp.float32, -lim1, lim1)
    b1 = jax.random.uniform(k2, (hidden_dim,), jnp.float32, -lim1, lim1)
    w2 = jax.random.uniform(k3, (hidden_dim, 3), jnp.float32, -lim2, lim2)
    b2 = jax.random.uniform(k4, (3,), jnp.float32, -lim2, lim2)
    return w1, b1, w2, b2


def reference_forward(state, w1, b1, w2, b2):
    h = jnp.maximum(state @ w1 + b1, 0.0)
    logits = h @ w2 + b2
    return {
        "confidence": jax.nn.sigmoid(logits[:, 0]),
        "mistake_detection": jax.nn.sigmoid(logits[:, 1]),
        "time_needed": jax.nn.softplus(logits[:, 2]),
    }


if __name__ == "__main__":
    D_IN, H = 32, 128
    key = jax.random.PRNGKey(0)
    k_x, k_p, k_x2 = jax.random.split(key, 3)
    w1, b1, w2, b2 = init_params(k_p, D_IN, H)
    params = prepare_params(w1, b1, w2, b2)

    # Small-batch check (single grid step; blocks equal full array dims).
    B = 8
    state = jax.random.normal(k_x, (B, D_IN), jnp.float32)
    out = jax.block_until_ready(metacognitive_forward(state, params))
    ref = reference_forward(state, w1, b1, w2, b2)
    for name in ("confidence", "mistake_detection", "time_needed"):
        assert out[name].shape == (B,)
        # bf16 MXU inputs -> relaxed tolerance vs. the f32 reference.
        assert jnp.allclose(out[name], ref[name], atol=2e-2, rtol=2e-2), name

    # Multi-tile check with a small tile: grid of 4 with a ragged last tile
    # (1000 = 3*256 + 232), resident weights, parallel batch axis, masked
    # lane-dense writeback on the partial tile.
    B2 = 1000
    state2 = jax.random.normal(k_x2, (B2, D_IN), jnp.float32)
    out2 = jax.block_until_ready(metacognitive_forward(state2, params, tile_b=256))
    ref2 = reference_forward(state2, w1, b1, w2, b2)
    for name in ("confidence", "mistake_detection", "time_needed"):
        assert out2[name].shape == (B2,)
        assert jnp.allclose(out2[name], ref2[name], atol=2e-2, rtol=2e-2), name

    print("KERNEL_OK")
</pallas_src>

<mosaic_0001>
module attributes {stable_mosaic.version = 11 : i64} {
  func.func @metacog_kernel(%arg0: i32, %arg1: memref<8x32xf32, #tpu.memory_space<vmem>>, %arg2: memref<32x128xbf16, #tpu.memory_space<vmem>>, %arg3: memref<1x128xf32, #tpu.memory_space<vmem>>, %arg4: memref<128x128xbf16, #tpu.memory_space<vmem>>, %arg5: memref<1x8xf32, #tpu.memory_space<vmem>>, %arg6: memref<8x8xf32, #tpu.memory_space<vmem>>) attributes {dimension_semantics = [#tpu.dimension_semantics<parallel>], iteration_bounds = array<i64: 1>, scalar_prefetch = 0 : i64, scratch_operands = 0 : i64, tpu.core_type = #tpu.core_type<tc>, window_params = [{transform_indices = @transform_0, window_bounds = array<i64: 8, 32>}, {pipeline_mode = #tpu.pipeline_mode<synchronous>, transform_indices = @transform_1, window_bounds = array<i64: 32, 128>}, {pipeline_mode = #tpu.pipeline_mode<synchronous>, transform_indices = @transform_2, window_bounds = array<i64: 1, 128>}, {pipeline_mode = #tpu.pipeline_mode<synchronous>, transform_indices = @transform_3, window_bounds = array<i64: 128, 128>}, {pipeline_mode = #tpu.pipeline_mode<synchronous>, transform_indices = @transform_4, window_bounds = array<i64: 1, 8>}, {transform_indices = @transform_5, window_bounds = array<i64: 8, 8>}]} {
    %c0 = arith.constant 0 : index
    %c0_0 = arith.constant 0 : index
    %0 = vector.load %arg1[%c0, %c0_0] : memref<8x32xf32, #tpu.memory_space<vmem>>, vector<8x32xf32>
    %1 = arith.truncf %0 : vector<8x32xf32> to vector<8x32xbf16>
    %c0_1 = arith.constant 0 : index
    %c0_2 = arith.constant 0 : index
    %2 = vector.load %arg2[%c0_1, %c0_2] : memref<32x128xbf16, #tpu.memory_space<vmem>>, vector<32x128xbf16>
    %cst = arith.constant dense<0.000000e+00> : vector<8x128xf32>
    %3 = tpu.matmul %1, %2, %cst {dimension_numbers = #tpu.dot_dimension_numbers<[1], [0], [0], [1], [0, 0, 1, 1], [], []>} : vector<8x32xbf16>, vector<32x128xbf16>, vector<8x128xf32> -> vector<8x128xf32>
    %c0_3 = arith.constant 0 : index
    %c0_4 = arith.constant 0 : index
    %4 = vector.load %arg3[%c0_3, %c0_4] : memref<1x128xf32, #tpu.memory_space<vmem>>, vector<1x128xf32>
    %5 = vector.broadcast %4 : vector<1x128xf32> to vector<8x128xf32>
    %6 = arith.addf %3, %5 : vector<8x128xf32>
    %cst_5 = arith.constant 0.000000e+00 : f32
    %7 = vector.broadcast %cst_5 : f32 to vector<8x128xf32>
    %8 = arith.maximumf %6, %7 : vector<8x128xf32>
    %9 = arith.truncf %8 : vector<8x128xf32> to vector<8x128xbf16>
    %c0_6 = arith.constant 0 : index
    %c0_7 = arith.constant 0 : index
    %10 = vector.load %arg4[%c0_6, %c0_7] : memref<128x128xbf16, #tpu.memory_space<vmem>>, vector<128x128xbf16>
    %cst_8 = arith.constant dense<0.000000e+00> : vector<8x128xf32>
    %11 = tpu.matmul %9, %10, %cst_8 {dimension_numbers = #tpu.dot_dimension_numbers<[1], [0], [0], [1], [0, 0, 1, 1], [], []>} : vector<8x128xbf16>, vector<128x128xbf16>, vector<8x128xf32> -> vector<8x128xf32>
    %12 = vector.extract_strided_slice %11 {offsets = [0, 0], sizes = [8, 8], strides = [1, 1]} : vector<8x128xf32> to vector<8x8xf32>
    %c0_9 = arith.constant 0 : index
    %c0_10 = arith.constant 0 : index
    %13 = vector.load %arg5[%c0_9, %c0_10] : memref<1x8xf32, #tpu.memory_space<vmem>>, vector<1x8xf32>
    %14 = vector.broadcast %13 : vector<1x8xf32> to vector<8x8xf32>
    %15 = arith.addf %12, %14 : vector<8x8xf32>
    %16 = tpu.transpose %15, [1, 0] : vector<8x8xf32> -> vector<8x8xf32>
    %17 = arith.negf %16 : vector<8x8xf32>
    %18 = math.exp %17 : vector<8x8xf32>
    %cst_11 = arith.constant 1.000000e+00 : f32
    %19 = vector.broadcast %cst_11 : f32 to vector<8x8xf32>
    %20 = arith.addf %19, %18 : vector<8x8xf32>
    %21 = arith.divf %19, %20 : vector<8x8xf32>
    %cst_12 = arith.constant 0.000000e+00 : f32
    %22 = vector.broadcast %cst_12 : f32 to vector<8x8xf32>
    %23 = arith.maximumf %16, %22 : vector<8x8xf32>
    %24 = vector.broadcast %cst_12 : f32 to vector<8x8xf32>
    %25 = arith.subf %16, %24 : vector<8x8xf32>
    %26 = arith.cmpf one, %25, %25 : vector<8x8xf32>
    %27 = vector.broadcast %cst_12 : f32 to vector<8x8xf32>
    %28 = arith.addf %16, %27 : vector<8x8xf32>
    %29 = math.absf %25 : vector<8x8xf32>
    %cst_13 = arith.constant 0.000000e+00 : f32
    %30 = vector.broadcast %cst_13 : f32 to vector<8x8xf32>
    %31 = arith.subf %30, %29 : vector<8x8xf32>
    %32 = math.exp %31 : vector<8x8xf32>
    %33 = math.log1p %32 : vector<8x8xf32>
    %34 = arith.addf %23, %33 : vector<8x8xf32>
    %35 = arith.select %26, %28, %34 : vector<8x8xi1>, vector<8x8xf32>
    %36 = tpu.iota {dimensions = array<i32: 0>} : vector<8x8xi32>
    %c2_i32 = arith.constant 2 : i32
    %37 = vector.broadcast %c2_i32 : i32 to vector<8x8xi32>
    %38 = arith.cmpi eq, %36, %37 : vector<8x8xi32>
    %39 = arith.select %38, %35, %21 : vector<8x8xi1>, vector<8x8xf32>
    %c0_14 = arith.constant 0 : index
    %c0_15 = arith.constant 0 : index
    %40 = vector.load %arg6[%c0_14, %c0_15] : memref<8x8xf32, #tpu.memory_space<vmem>>, vector<8x8xf32>
    tpu.vector_store %arg6[%c0_14, %c0_15], %39 {strides = array<i32>} : memref<8x8xf32, #tpu.memory_space<vmem>>, vector<8x8xf32>,
    return
  }
  func.func @transform_0(%arg0: i32) -> (i32, i32) {
    %c0_i32 = arith.constant 0 : i32
    %c0_i32_0 = arith.constant 0 : i32
    return %arg0, %c0_i32 : i32, i32
  }
  func.func @transform_1(%arg0: i32) -> (i32, i32) {
    %c0_i32 = arith.constant 0 : i32
    %c0_i32_0 = arith.constant 0 : i32
    %c0_i32_1 = arith.constant 0 : i32
    return %c0_i32, %c0_i32_0 : i32, i32
  }
  func.func @transform_2(%arg0: i32) -> (i32, i32) {
    %c0_i32 = arith.constant 0 : i32
    %c0_i32_0 = arith.constant 0 : i32
    %c0_i32_1 = arith.constant 0 : i32
    return %c0_i32, %c0_i32_0 : i32, i32
  }
  func.func @transform_3(%arg0: i32) -> (i32, i32) {
    %c0_i32 = arith.constant 0 : i32
    %c0_i32_0 = arith.constant 0 : i32
    %c0_i32_1 = arith.constant 0 : i32
    return %c0_i32, %c0_i32_0 : i32, i32
  }
  func.func @transform_4(%arg0: i32) -> (i32, i32) {
    %c0_i32 = arith.constant 0 : i32
    %c0_i32_0 = arith.constant 0 : i32
    %c0_i32_1 = arith.constant 0 : i32
    return %c0_i32, %c0_i32_0 : i32, i32
  }
  func.func @transform_5(%arg0: i32) -> (i32, i32) {
    %c0_i32 = arith.constant 0 : i32
    %c0_i32_0 = arith.constant 0 : i32
    return %c0_i32, %arg0 : i32, i32
  }
}

</mosaic_0001>

<bundles_post_ra>
// kernel: metacognitive_forward.1
= control target key start
LH: loop header
LB: loop body
LE: loop exit
PB: predicated region body
PF: predicated region fallthrough
CT: control target
= control target key end

     0   :  { %10 = vsyncpa [#allocation3], 0  ;;  %s467_s0 = inlined_call_operand.hbm [shape: f32[8,32], index: 0, kind: input, shape index: {}]   ;;  %s468_s1 = inlined_call_operand.hbm [shape: bf16[32,128], index: 1, kind: input, shape index: {}]   ;;  %s469_s2 = inlined_call_operand.vmem [shape: f32[1,128], index: 2, kind: input, shape index: {}]   ;;  %s470_s3 = inlined_call_operand.hbm [shape: bf16[128,128], index: 3, kind: input, shape index: {}]   ;;  %s471_s4 = inlined_call_operand.vmem [shape: f32[1,8], index: 4, kind: input, shape index: {}]   ;;  %s472_s5 = inlined_call_operand.vmem [shape: f32[8,8], index: 5, kind: output, shape index: {}]  }
   0x1   :  { %11 = vsyncpa [#allocation5], 0  ;;  %s27_s20 = sshll.u32 %s468_s1, 4  ;;  %s414_s21 = smov [#allocation4]   ;;  %s28_s20 = int_to_ptr.hbm [resolvable:$true] %s27_s20 }
   0x2   :  { %s29_s22 = sshll.u32 %s414_s21, 4  ;;  %s17_s25 = sshll.u32 %s467_s0, 4  ;;  %s30_s22 = int_to_ptr.vmem [resolvable:$true] %s29_s22  ;;  %s18_s25 = int_to_ptr.hbm [resolvable:$true] %s17_s25 }
   0x3   :  { %s415_s26 = smov 64   ;;  %s416_s27 = smov 4  }
   0x4   :  { %35 = dma.hbm_to_vmem [thread:$0]  %s28_s20, 256, %s30_s22, [#allocation5], %s415_s26, %s415_s26, %s416_s27  }
   0x5   :  { %s417_s28 = smov [#allocation2]   ;;  %s42_s7 = sshll.u32 %s470_s3, 4  ;;  %s43_s7 = int_to_ptr.hbm [resolvable:$true] %s42_s7 }
   0x6   :  { %s19_s29 = sshll.u32 %s417_s28, 4  ;;  %s418_s1 = smov [#allocation6]   ;;  %s20_s29 = int_to_ptr.vmem [resolvable:$true] %s19_s29 }
   0x7   :  { %22 = dma.hbm_to_vmem [thread:$0]  %s18_s25, 128, %s20_s29, [#allocation3]  }
   0x8   :  { %s44_s8 = sshll.u32 %s418_s1, 4  ;;  %s45_s8 = int_to_ptr.vmem [resolvable:$true] %s44_s8 }
   0x9   :  { %50 = dma.hbm_to_vmem [thread:$0]  %s43_s7, 1024, %s45_s8, [#allocation5], %s415_s26, %s415_s26, %s416_s27  }
   0xa   :  { %410 = dma.done.wait [#allocation3], 128  }
   0xb   :  { %411 = vsyncadd [#allocation3], 4294967168 }
   0xc   :  { %412 = dma.done.wait [#allocation5], 1280  }
   0xd   :  { %413 = vsyncadd [#allocation5], 4294966016  ;;  %v313_v0 = vld [vmem:[#allocation4 + $0x8] sm:$0xff]  ;;  %v312_v2 = vld [vmem:[#allocation4] sm:$0xff]  ;;  %vm88_vm0 = vcmask 261120   ;;  %v258_v33 = vlaneseq  ;;  %vm262_vm6 = vcmask 64512  }
   0xe   :  { %v321_v1 = vld [vmem:[#allocation6 + $0x38] sm:$0xff]  ;;  %98 = vmatpush.bf16.msra.mxu0 %v313_v0  ;;  %v66_v3 = vld [vmem:[#allocation2] sm:$0xff]  ;;  %v320_v4 = vld [vmem:[#allocation6 + $0x30] sm:$0xff] }
   0xf   :  { %171 = vmatpush.bf16.msra.mxu1 %v321_v1  ;;  %v67_v5 = vpack.c.bf16 %v66_v3, %v66_v3  ;;  %v319_v6 = vld [vmem:[#allocation6 + $0x28] sm:$0xff]  ;;  %v318_v7 = vld [vmem:[#allocation6 + $0x20] sm:$0xff]  ;;  %v317_v8 = vld [vmem:[#allocation6 + $0x18] sm:$0xff]  ;;  %v259_v39 = vshrl.u32 %v258_v33, 7 }
  0x10   :  { %v316_v9 = vld [vmem:[#allocation6 + $0x10] sm:$0xff]  ;;  %v315_v10 = vld [vmem:[#allocation6 + $0x8] sm:$0xff]  ;;  %v314_v11 = vld [vmem:[#allocation6] sm:$0xff] }
  0x11   :  { %v328_v12 = vld [vmem:[%s469_s2] ss:$0 sm:$0xff]  ;;  %vm260_vm4 = vcmp.eq.s32.totalorder %v259_v39, 2 }
  0x12   :  { %99 = vmatpush.bf16.msra.mxu0 %v312_v2  ;;  %v329_v18 = vld [vmem:[%s471_s4] ss:$0 sm:$0xff] }
  0x13   :  { %172 = vmatpush.bf16.msra.mxu1 %v320_v4 }
  0x15   :  { %278 = vmatmul.msk.bf16.vlgmr.msra.gmra.mxu0 %vm88_vm0, %v67_v5 }
  0x17   :  { %173 = vmatpush.bf16.msra.mxu1 %v319_v6 }
  0x1b   :  { %174 = vmatpush.bf16.msra.mxu1 %v318_v7 }
  0x1f   :  { %175 = vmatpush.bf16.msra.mxu1 %v317_v8 }
  0x23   :  { %176 = vmatpush.bf16.msra.mxu1 %v316_v9 }
  0x27   :  { %177 = vmatpush.bf16.msra.mxu1 %v315_v10 }
  0x2b   :  { %178 = vmatpush.bf16.msra.mxu1 %v314_v11 }
  0x92   :  { %v101_v13 = vpop.f32.mrf.mxu0 }
  0x93   :  { %v102_v14 = vadd.f32 %v328_v12, %v101_v13 }
  0x95   :  { %v105_v15 = vmax.f32 %v102_v14, 0.0 }
  0x97   :  { %v106_v16 = vpack.c.bf16 %v105_v15, %v105_v15 }
  0x99   :  { %179 = vmatmul.bf16.vlgmr.msra.gmra.mxu1 %v106_v16 }
  0x9a   :  { %v103_v17 = vpop.f32.mrf.mxu0 }
 0x116   :  { %v180_v19 = vpop.f32.mrf.mxu1 }
 0x117   :  { %v188_v20 = vadd.f32 %v329_v18, %v180_v19 }
 0x119   :  { %189 = vxpose.xlu0.b32.start.end [1/1] (short) (narrow) %v188_v20, 8 }
 0x11e   :  { %v182_v21 = vpop.f32.mrf.mxu1 }
 0x1bd   :  { %v205_v22 = vpop.trf.xlu0 }
 0x1be   :  { %v311_v23 = vmul.f32 -1.442695, %v205_v22  ;;  %v243_v24 = vand.u32 2147483647, %v205_v22  ;;  %v240_v45 = vmax.f32 %v205_v22, 0.0  ;;  %vm241_vm8 = vcmp.ne.f32.partialorder %v205_v22, %v205_v22 }
 0x1c0   :  { %330 = vpow2.f32 %v311_v23  ;;  %v244_v25 = vsub.f32 0.0, %v243_v24 }
 0x1c2   :  { %v245_v26 = vmul.f32 1.442695, %v244_v25 }
 0x1c4   :  { %332 = vpow2.f32 %v245_v26 }
 0x1c6   :  { %v331_v27 = vpop.eup %330 }
 0x1c7   :  { %v224_v28 = vadd.f32 1.0, %v331_v27 }
 0x1c9   :  { %334 = vrcp.f32 %v224_v28  ;;  %v234_v40 = vand.u32 2147483647, %v224_v28  ;;  %v236_v41 = vand.u32 2147483648, %v224_v28  ;;  %vm230_vm3 = vweird.f32 %v224_v28 }
 0x1ca   :  { %v333_v29 = vpop.eup %332 }
 0x1cb   :  { %v247_v30 = vadd.f32 1.0, %v333_v29  ;;  %v250_v31 = vmul.f32 -0.5, %v333_v29  ;;  %v253_v36 = vand.u32 2147483647, %v333_v29  ;;  %v237_v48 = vor.u32 1.1754944e-38, %v236_v41 }
 0x1cc   :  { %vm235_vm7 = vcmp.eq.f32.partialorder %v234_v40, 8.507059e+37 }
 0x1cd   :  { %336 = vlog2.f32 %v247_v30  ;;  %v251_v35 = vadd.f32 1.0, %v250_v31  ;;  %vm254_vm2 = vcmp.lt.f32.partialorder %v253_v36, 0.0004427343 }
 0x1cf   :  { %v335_v32 = vpop.eup %334  ;;  %v252_v44 = vmul.f32 %v333_v29, %v251_v35 }
 0x1d0   :  { %v226_v34 = vmul.f32 %v335_v32, %v224_v28  ;;  %vm231_vm1 = vweird.f32 %v335_v32 }
 0x1d1   :  { %vm232_vm5 = vmor %vm230_vm3, %vm231_vm1 }
 0x1d2   :  { %v227_v37 = vsub.f32 1.0, %v226_v34 }
 0x1d3   :  { %v337_v38 = vpop.eup %336 }
 0x1d4   :  { %v228_v42 = vmul.f32 %v335_v32, %v227_v37  ;;  %v249_v43 = vmul.f32 0.6931472, %v337_v38 }
 0x1d6   :  { %v229_v46 = vadd.f32 %v335_v32, %v228_v42  ;;  %v255_v47 = vsel %vm254_vm2, %v252_v44, %v249_v43 }
 0x1d7   :  { %v256_v49 = vadd.f32 %v255_v47, %v240_v45 }
 0x1d8   :  { %v233_v50 = vsel %vm232_vm5, %v335_v32, %v229_v46 }
 0x1d9   :  { %v238_v51 = vsel %vm235_vm7, %v237_v48, %v233_v50  ;;  %v257_v52 = vsel %vm241_vm8, %v205_v22, %v256_v49 }
 0x1da   :  { %v261_v53 = vsel %vm260_vm4, %v257_v52, %v238_v51 }
 0x1db   :  { %263 = vst.msk [vmem:[%s472_s5] sm:$0xff] %vm262_vm6, %v261_v53 }
 0x1dc   :  { %268 = vsyncpa [#allocation3], 1 }
 0x1dd   :  { %269 = vsyncpa [#allocation5], 1 }

</bundles_post_ra>
